<compile_context>
chip_gen: v5e
topology: v5e:2x2
jax: 0.10.0
libtpu: 0.0.40
codegen_flags: <defaults>
</compile_context>

<pallas_src>
import jax
import jax.numpy as jnp
from jax.experimental import pallas as pl
from jax.experimental.pallas import tpu as pltpu


def linear_sigmoid_kernel(w_ref, b_ref, x_ref, o_ref):
    # w_ref: SMEM (3,) f32, b_ref: SMEM (1,) f32
    # x_ref: VMEM (3, rt, 128) f32  (features leading, batch as dense (rt,128) tiles)
    # o_ref: VMEM (rt, 128) f32     (lane- and sublane-dense output tile)
    x0 = x_ref[0]
    x1 = x_ref[1]
    x2 = x_ref[2]
    w0 = w_ref[0]
    w1 = w_ref[1]
    w2 = w_ref[2]
    bias = b_ref[0]
    # Pure VPU broadcast-FMA contraction over the 3 input features.
    y = x0 * w0 + x1 * w1 + x2 * w2 + bias            # (rt, 128) dense
    # Sigmoid on the EUP: sigmoid(y) = 0.5 * tanh(0.5 * y) + 0.5
    o_ref[...] = 0.5 * jnp.tanh(0.5 * y) + 0.5


def _round_up(n, m):
    return ((n + m - 1) // m) * m


def custom_model_forward(x, w, b, *, row_tile=2048, small_batch_threshold=1024,
                         force_pallas=False):
    """x: [B, 3] f32, w: [3, 1] f32, b: [1] f32 -> [B, 1] f32."""
    B = x.shape[0]
    xf = x.astype(jnp.float32)
    wf = w.astype(jnp.float32)
    bf = b.astype(jnp.float32)

    # At tiny B the pad/transpose/launch fixed costs dwarf the actual compute;
    # let XLA's fused elementwise path handle it.
    if B <= small_batch_threshold and not force_pallas:
        return jax.nn.sigmoid(xf @ wf + bf[None, :])

    # Pad batch only to 8*128 granularity (one vreg tile), not to a multiple of
    # the block size: grid uses cdiv and the last partial block is masked.
    b_pad = _round_up(B, 8 * 128)
    nrows = b_pad // 128                      # multiple of 8

    if nrows <= row_tile:
        rt = nrows                            # single block, full row extent
    else:
        rt = max(8, (row_tile // 8) * 8)      # sublane-aligned row tile
    grid = (pl.cdiv(nrows, rt),)

    # Feature-major relayout + pad, then a free reshape into dense (nrows,128) tiles.
    x_t = jnp.pad(xf.T, ((0, 0), (0, b_pad - B))).reshape(3, nrows, 128)
    w1d = wf.reshape(-1)   # (3,)
    b1d = bf.reshape(-1)   # (1,)

    out = pl.pallas_call(
        linear_sigmoid_kernel,
        out_shape=jax.ShapeDtypeStruct((nrows, 128), jnp.float32),
        grid=grid,
        in_specs=[
            # Scalars live in SMEM (whole array, no tiling).
            pl.BlockSpec(memory_space=pltpu.MemorySpace.SMEM),
            pl.BlockSpec(memory_space=pltpu.MemorySpace.SMEM),
            # x: all 3 features, rt rows of 128 batch lanes per step.
            pl.BlockSpec((3, rt, 128), lambda i: (0, i, 0)),
        ],
        out_specs=pl.BlockSpec((rt, 128), lambda i: (i, 0)),
        compiler_params=pltpu.CompilerParams(
            dimension_semantics=("parallel",),
        ),
    )(w1d, b1d, x_t)

    # Back to the PyTorch layout [B, 1] (padded tail sliced away).
    return out.reshape(b_pad)[:B].reshape(B, 1)


def reference_forward(x, w, b):
    return jax.nn.sigmoid(x.astype(jnp.float32) @ w + b[None, :])


if __name__ == "__main__":
    key = jax.random.PRNGKey(0)
    kx, kw, kb = jax.random.split(key, 3)

    IN, OUT = 3, 1
    # Deterministic init mimicking PyTorch's U(-1/sqrt(fan_in), 1/sqrt(fan_in)).
    bound = 1.0 / jnp.sqrt(jnp.float32(IN))
    w = jax.random.uniform(kw, (IN, OUT), jnp.float32, minval=-bound, maxval=bound)
    b = jax.random.uniform(kb, (OUT,), jnp.float32, minval=-bound, maxval=bound)

    # 1) Small batch forced through the Pallas path (single dense block).
    B = 8
    x = jax.random.normal(kx, (B, IN), jnp.float32)
    out = custom_model_forward(x, w, b, force_pallas=True)
    jax.block_until_ready(out)
    ref = reference_forward(x, w, b)
    assert out.shape == (B, OUT)
    assert jnp.allclose(out, ref, atol=2e-5, rtol=2e-5)

    # 2) Small batch with default dispatch (fused XLA path).
    out_xla = custom_model_forward(x, w, b)
    jax.block_until_ready(out_xla)
    assert jnp.allclose(out_xla, ref, atol=2e-5, rtol=2e-5)

    # 3) Multi-block grid path (small row_tile so the grid is exercised at small B).
    B2 = 4096
    x2 = jax.random.normal(kx, (B2, IN), jnp.float32)
    out2 = custom_model_forward(x2, w, b, row_tile=8)
    jax.block_until_ready(out2)
    assert jnp.allclose(out2, reference_forward(x2, w, b), atol=2e-5, rtol=2e-5)

    # 4) Uneven batch -> cdiv grid with masked partial last block.
    B3 = 4100
    x3 = jax.random.normal(kx, (B3, IN), jnp.float32)
    out3 = custom_model_forward(x3, w, b, row_tile=16)
    jax.block_until_ready(out3)
    assert jnp.allclose(out3, reference_forward(x3, w, b), atol=2e-5, rtol=2e-5)

    # 5) Default (large) row tile, single block covering everything.
    out4 = custom_model_forward(x2, w, b)
    jax.block_until_ready(out4)
    assert jnp.allclose(out4, reference_forward(x2, w, b), atol=2e-5, rtol=2e-5)

    print("KERNEL_OK")
</pallas_src>

<mosaic_0001>
module attributes {stable_mosaic.version = 11 : i64} {
  func.func @linear_sigmoid_kernel(%arg0: i32, %arg1: memref<3xf32, #tpu.memory_space<smem>>, %arg2: memref<1xf32, #tpu.memory_space<smem>>, %arg3: memref<3x8x128xf32, #tpu.memory_space<vmem>>, %arg4: memref<8x128xf32, #tpu.memory_space<vmem>>) attributes {dimension_semantics = [#tpu.dimension_semantics<parallel>], iteration_bounds = array<i64: 1>, scalar_prefetch = 0 : i64, scratch_operands = 0 : i64, tpu.core_type = #tpu.core_type<tc>, window_params = [{transform_indices = @transform_0, window_bounds = array<i64: 3>}, {transform_indices = @transform_1, window_bounds = array<i64: 1>}, {transform_indices = @transform_2, window_bounds = array<i64: 3, 8, 128>}, {transform_indices = @transform_3, window_bounds = array<i64: 8, 128>}]} {
    %c0 = arith.constant 0 : index
    %c0_0 = arith.constant 0 : index
    %c0_1 = arith.constant 0 : index
    %0 = vector.load %arg3[%c0, %c0_0, %c0_1] : memref<3x8x128xf32, #tpu.memory_space<vmem>>, vector<1x8x128xf32>
    %1 = vector.shape_cast %0 : vector<1x8x128xf32> to vector<8x128xf32>
    %c1 = arith.constant 1 : index
    %c0_2 = arith.constant 0 : index
    %c0_3 = arith.constant 0 : index
    %2 = vector.load %arg3[%c1, %c0_2, %c0_3] : memref<3x8x128xf32, #tpu.memory_space<vmem>>, vector<1x8x128xf32>
    %3 = vector.shape_cast %2 : vector<1x8x128xf32> to vector<8x128xf32>
    %c2 = arith.constant 2 : index
    %c0_4 = arith.constant 0 : index
    %c0_5 = arith.constant 0 : index
    %4 = vector.load %arg3[%c2, %c0_4, %c0_5] : memref<3x8x128xf32, #tpu.memory_space<vmem>>, vector<1x8x128xf32>
    %5 = vector.shape_cast %4 : vector<1x8x128xf32> to vector<8x128xf32>
    %c0_6 = arith.constant 0 : index
    %6 = memref.load %arg1[%c0_6] : memref<3xf32, #tpu.memory_space<smem>>
    %c1_7 = arith.constant 1 : index
    %7 = memref.load %arg1[%c1_7] : memref<3xf32, #tpu.memory_space<smem>>
    %c2_8 = arith.constant 2 : index
    %8 = memref.load %arg1[%c2_8] : memref<3xf32, #tpu.memory_space<smem>>
    %c0_9 = arith.constant 0 : index
    %9 = memref.load %arg2[%c0_9] : memref<1xf32, #tpu.memory_space<smem>>
    %10 = vector.broadcast %6 : f32 to vector<8x128xf32>
    %11 = arith.mulf %1, %10 : vector<8x128xf32>
    %12 = vector.broadcast %7 : f32 to vector<8x128xf32>
    %13 = arith.mulf %3, %12 : vector<8x128xf32>
    %14 = arith.addf %11, %13 : vector<8x128xf32>
    %15 = vector.broadcast %8 : f32 to vector<8x128xf32>
    %16 = arith.mulf %5, %15 : vector<8x128xf32>
    %17 = arith.addf %14, %16 : vector<8x128xf32>
    %18 = vector.broadcast %9 : f32 to vector<8x128xf32>
    %19 = arith.addf %17, %18 : vector<8x128xf32>
    %cst = arith.constant 5.000000e-01 : f32
    %20 = vector.broadcast %cst : f32 to vector<8x128xf32>
    %21 = arith.mulf %20, %19 : vector<8x128xf32>
    %22 = math.tanh %21 : vector<8x128xf32>
    %cst_10 = arith.constant 5.000000e-01 : f32
    %23 = vector.broadcast %cst_10 : f32 to vector<8x128xf32>
    %24 = arith.mulf %23, %22 : vector<8x128xf32>
    %cst_11 = arith.constant 5.000000e-01 : f32
    %25 = vector.broadcast %cst_11 : f32 to vector<8x128xf32>
    %26 = arith.addf %24, %25 : vector<8x128xf32>
    %c0_12 = arith.constant 0 : index
    %c0_13 = arith.constant 0 : index
    %27 = vector.load %arg4[%c0_12, %c0_13] : memref<8x128xf32, #tpu.memory_space<vmem>>, vector<8x128xf32>
    tpu.vector_store %arg4[%c0_12, %c0_13], %26 {strides = array<i32>} : memref<8x128xf32, #tpu.memory_space<vmem>>, vector<8x128xf32>,
    return
  }
  func.func @transform_0(%arg0: i32) -> i32 {
    %c0_i32 = arith.constant 0 : i32
    %c0_i32_0 = arith.constant 0 : i32
    return %c0_i32 : i32
  }
  func.func @transform_1(%arg0: i32) -> i32 {
    %c0_i32 = arith.constant 0 : i32
    %c0_i32_0 = arith.constant 0 : i32
    return %c0_i32 : i32
  }
  func.func @transform_2(%arg0: i32) -> (i32, i32, i32) {
    %c0_i32 = arith.constant 0 : i32
    %c0_i32_0 = arith.constant 0 : i32
    %c0_i32_1 = arith.constant 0 : i32
    return %c0_i32, %arg0, %c0_i32_0 : i32, i32, i32
  }
  func.func @transform_3(%arg0: i32) -> (i32, i32) {
    %c0_i32 = arith.constant 0 : i32
    %c0_i32_0 = arith.constant 0 : i32
    return %arg0, %c0_i32 : i32, i32
  }
}

</mosaic_0001>

<bundles_post_ra>
// kernel: tpu_custom_call.1
= control target key start
LH: loop header
LB: loop body
LE: loop exit
PB: predicated region body
PF: predicated region fallthrough
CT: control target
= control target key end

     0   :  { %9 = vsyncpa [#allocation6], 0  ;;  %s199_s0 = inlined_call_operand.vmem [shape: f32[3], index: 0, kind: input, shape index: {}]   ;;  %s200_s1 = inlined_call_operand.<no memory space> [shape: f32[1], index: 1, kind: input, shape index: {}]   ;;  %s201_s2 = inlined_call_operand.hbm [shape: f32[3,8,128], index: 2, kind: input, shape index: {}]   ;;  %s202_s3 = inlined_call_operand.hbm [shape: f32[8,128], index: 3, kind: output, shape index: {}]  }
   0x1   :  { %10 = vsyncpa [#allocation4], 0 }
   0x2   :  { %11 = vsyncpa [#allocation5], 0  ;;  %s17_s14 = sshll.u32 %s199_s0, 4  ;;  %s27_s17 = sshll.u32 %s201_s2, 4  ;;  %s18_s14 = int_to_ptr.vmem [resolvable:$true] %s17_s14  ;;  %s28_s17 = int_to_ptr.hbm [resolvable:$true] %s27_s17 }
   0x3   :  { %s162_s18 = smov [#allocation3]   ;;  %s163_s19 = smov [#allocation7]  }
   0x4   :  { %20 = dma.vmem_to_smem %s18_s14, 16, %s162_s18, [#allocation6]  }
   0x5   :  { %s29_s20 = sshll.u32 %s163_s19, 4  ;;  %s164_s21 = smov 128   ;;  %s30_s20 = int_to_ptr.vmem [resolvable:$true] %s29_s20 }
   0x6   :  { %s165_s22 = smov 8  }
   0x7   :  { %35 = dma.hbm_to_vmem [thread:$0]  %s28_s17, 384, %s30_s20, [#allocation4], %s164_s21, %s164_s21, %s165_s22  }
   0x8   :  { %156 = dma.done.wait [#allocation6], 16  }
   0x9   :  { %157 = vsyncadd [#allocation6], 4294967280 }
   0xa   :  { %158 = dma.done.wait [#allocation4], 384  }
   0xb   :  { %159 = vsyncadd [#allocation4], 4294966912 }
   0xc   :  { %44 = sfence }
   0xd   :  { %s50_s0 = sld [smem:[#allocation3]]  ;;  %v45_v0 = vld [vmem:[#allocation7] sm:$0xff]  ;;  %v47_v1 = vld [vmem:[#allocation7 + $0x8] sm:$0xff]  ;;  %v49_v2 = vld [vmem:[#allocation7 + $0x10] sm:$0xff]  ;;  %v62_v10 = vstv %s200_s1  ;;  %s166_s26 = smov [#allocation8]  }
   0xe   :  { %s87_s23 = sld [smem:[#allocation3 + $0x1]]  ;;  %s74_s27 = sshll.u32 %s166_s26, 4  ;;  %s75_s27 = int_to_ptr.vmem [resolvable:$true] %s74_s27 }
   0xf   :  { %s88_s24 = sld [smem:[#allocation3 + $0x2]]  ;;  %s76_s30 = sshll.u32 %s202_s3, 4  ;;  %s77_s30 = int_to_ptr.hbm [resolvable:$true] %s76_s30 }
  0x13   :  { %v54_v3 = vstv %s50_s0 }
  0x14   :  { %v55_v4 = vmul.f32 %v54_v3, %v45_v0  ;;  %v56_v5 = vstv %s87_s23 }
  0x15   :  { %v57_v6 = vmul.f32 %v56_v5, %v47_v1  ;;  %v59_v7 = vstv %s88_s24 }
  0x16   :  { %v60_v8 = vmul.f32 %v59_v7, %v49_v2 }
  0x17   :  { %v58_v9 = vadd.f32 %v57_v6, %v55_v4 }
  0x19   :  { %v61_v11 = vadd.f32 %v60_v8, %v58_v9 }
  0x1b   :  { %v63_v12 = vadd.f32 %v62_v10, %v61_v11 }
  0x1d   :  { %v64_v13 = vmul.f32 0.5, %v63_v12 }
  0x1f   :  { %94 = vtanh.f32 %v64_v13 }
  0x25   :  { %v95_v14 = vpop.eup %94 }
  0x26   :  { %v66_v15 = vmul.f32 0.5, %v95_v14 }
  0x28   :  { %v67_v16 = vadd.f32 0.5, %v66_v15 }
  0x2a   :  { %68 = vst [vmem:[#allocation8] sm:$0xff] %v67_v16 }
  0x2b   :  { %79 = dma.vmem_to_hbm [thread:$0]  %s75_s27, 128, %s77_s30, [#allocation5]  }
  0x2c   :  { %160 = dma.done.wait [#allocation5], 128  }
  0x2d   :  { %161 = vsyncadd [#allocation5], 4294967168 }
  0x2e   :  { %84 = vsyncpa [#allocation4], 1 }
  0x2f   :  { %85 = vsyncpa [#allocation5], 1 }
  0x30   :  { %86 = vsyncpa [#allocation6], 1 }

</bundles_post_ra>
